<compile_context>
chip_gen: v5e
topology: v5e:2x2
jax: 0.10.0
libtpu: 0.0.40
codegen_flags: <defaults>
</compile_context>

<pallas_src>
import jax
import jax.numpy as jnp
from jax.experimental import pallas as pl
from jax.experimental.pallas import tpu as pltpu

_EMO_DIM = 7
_SENT_DIM = 3
# VMEM budget for the per-step output tiles (x2 double buffers each); kept
# well under v5e's 16 MiB scoped default, with huge headroom on v6e/v7x.
_VMEM_BUDGET_BYTES = 8 * 1024 * 1024


def _round_up(x, m):
    return ((x + m - 1) // m) * m


def _repeat_kernel(emo_ref, sent_ref, out_emo_ref, out_sent_ref):
    # emo_ref: (1, 7), sent_ref: (1, 3) -- grid-invariant, VMEM-resident.
    # out_emo_ref: (tile_b, 7), out_sent_ref: (tile_b, 3) -- already in the
    # PyTorch output layout, so the wrapper never transposes.
    out_emo_ref[...] = jnp.broadcast_to(emo_ref[...], out_emo_ref.shape)
    out_sent_ref[...] = jnp.broadcast_to(sent_ref[...], out_sent_ref.shape)


def dummy_model_forward(params, inputs):
    """params = (param_sentiment (1,3), param_emotion (1,7));
    inputs = (transcripts, video_data, audio_data)."""
    param_sentiment, param_emotion = params
    _, _, audio_data = inputs
    # Matches PyTorch len(audio_data[0]) for the (1, B, ...) audio layout.
    batch_size = audio_data.shape[1] if hasattr(audio_data, "shape") else len(audio_data[0])

    emo_dtype = param_emotion.dtype
    sent_dtype = param_sentiment.dtype

    if batch_size == 0:
        return (jnp.zeros((0, _EMO_DIM), emo_dtype),
                jnp.zeros((0, _SENT_DIM), sent_dtype))

    # Per-batch-row output bytes across both outputs; x2 for double buffering.
    row_bytes = (_EMO_DIM * jnp.dtype(emo_dtype).itemsize
                 + _SENT_DIM * jnp.dtype(sent_dtype).itemsize)
    max_tile_b = max(8, ((_VMEM_BUDGET_BYTES // (2 * row_bytes)) // 8) * 8)

    b_pad8 = _round_up(batch_size, 8)
    if b_pad8 <= max_tile_b:
        tile_b = b_pad8          # single grid step for any realistic B
    else:
        tile_b = max_tile_b      # fallback tiling only for enormous B
    b_pad = _round_up(batch_size, tile_b)
    grid = (b_pad // tile_b,)

    out_emo, out_sent = pl.pallas_call(
        _repeat_kernel,
        out_shape=(
            jax.ShapeDtypeStruct((b_pad, _EMO_DIM), emo_dtype),
            jax.ShapeDtypeStruct((b_pad, _SENT_DIM), sent_dtype),
        ),
        grid=grid,
        in_specs=[
            # Block == full array dims -> (8,128) divisibility rule satisfied.
            pl.BlockSpec((1, _EMO_DIM), lambda i: (0, 0)),
            pl.BlockSpec((1, _SENT_DIM), lambda i: (0, 0)),
        ],
        out_specs=(
            # tile_b is a multiple of 8; last dims equal the full array dims.
            pl.BlockSpec((tile_b, _EMO_DIM), lambda i: (i, 0)),
            pl.BlockSpec((tile_b, _SENT_DIM), lambda i: (i, 0)),
        ),
        compiler_params=pltpu.CompilerParams(
            # Splits the (rare) multi-step case across v7x's two TCs; harmless
            # no-op for the single-step case and on v5e/v6e.
            dimension_semantics=("parallel",),
        ),
    )(param_emotion, param_sentiment)

    # Only a row slice (no transpose) to drop batch-pad rows.
    if b_pad != batch_size:
        out_emo = out_emo[:batch_size]
        out_sent = out_sent[:batch_size]

    # Match PyTorch forward return order: (emotion, sentiment)
    return out_emo, out_sent


if __name__ == "__main__":
    key = jax.random.PRNGKey(0)
    k_sent, k_emo, k_audio = jax.random.split(key, 3)

    # Deterministic parameter init (PyTorch leaves FloatTensor uninitialized).
    dummy_param_sentiment = jax.random.normal(k_sent, (1, _SENT_DIM), dtype=jnp.float32)
    dummy_param_emotion = jax.random.normal(k_emo, (1, _EMO_DIM), dtype=jnp.float32)
    params = (dummy_param_sentiment, dummy_param_emotion)

    # Synthetic inputs: forward only uses len(audio_data[0]) == batch size.
    batch = 2
    transcripts = jnp.zeros((batch, 8), dtype=jnp.int32)           # unused
    video_data = jnp.zeros((batch, 4, 16, 16), dtype=jnp.float32)  # unused
    audio_data = jax.random.normal(k_audio, (1, batch, 8), dtype=jnp.float32)

    out_emotion, out_sentiment = dummy_model_forward(
        params, (transcripts, video_data, audio_data)
    )
    jax.block_until_ready((out_emotion, out_sentiment))

    # Reference check (pure JAX repeat).
    ref_emotion = jnp.tile(dummy_param_emotion, (batch, 1))
    ref_sentiment = jnp.tile(dummy_param_sentiment, (batch, 1))
    assert out_emotion.shape == (batch, _EMO_DIM)
    assert out_sentiment.shape == (batch, _SENT_DIM)
    assert out_emotion.dtype == dummy_param_emotion.dtype
    assert out_sentiment.dtype == dummy_param_sentiment.dtype
    assert jnp.allclose(out_emotion, ref_emotion)
    assert jnp.allclose(out_sentiment, ref_sentiment)

    print("KERNEL_OK")
</pallas_src>

<mosaic_0001>
module attributes {stable_mosaic.version = 11 : i64} {
  func.func @_repeat_kernel(%arg0: i32, %arg1: memref<1x7xf32, #tpu.memory_space<vmem>>, %arg2: memref<1x3xf32, #tpu.memory_space<vmem>>, %arg3: memref<8x7xf32, #tpu.memory_space<vmem>>, %arg4: memref<8x3xf32, #tpu.memory_space<vmem>>) attributes {dimension_semantics = [#tpu.dimension_semantics<parallel>], iteration_bounds = array<i64: 1>, scalar_prefetch = 0 : i64, scratch_operands = 0 : i64, tpu.core_type = #tpu.core_type<tc>, window_params = [{pipeline_mode = #tpu.pipeline_mode<synchronous>, transform_indices = @transform_0, window_bounds = array<i64: 1, 7>}, {pipeline_mode = #tpu.pipeline_mode<synchronous>, transform_indices = @transform_1, window_bounds = array<i64: 1, 3>}, {transform_indices = @transform_2, window_bounds = array<i64: 8, 7>}, {transform_indices = @transform_3, window_bounds = array<i64: 8, 3>}]} {
    %c0 = arith.constant 0 : index
    %c0_0 = arith.constant 0 : index
    %0 = vector.load %arg1[%c0, %c0_0] : memref<1x7xf32, #tpu.memory_space<vmem>>, vector<1x7xf32>
    %1 = vector.shape_cast %0 : vector<1x7xf32> to vector<1x7xf32>
    %2 = vector.broadcast %1 : vector<1x7xf32> to vector<8x7xf32>
    %c0_1 = arith.constant 0 : index
    %c0_2 = arith.constant 0 : index
    %3 = vector.load %arg3[%c0_1, %c0_2] : memref<8x7xf32, #tpu.memory_space<vmem>>, vector<8x7xf32>
    tpu.vector_store %arg3[%c0_1, %c0_2], %2 {strides = array<i32>} : memref<8x7xf32, #tpu.memory_space<vmem>>, vector<8x7xf32>,
    %c0_3 = arith.constant 0 : index
    %c0_4 = arith.constant 0 : index
    %4 = vector.load %arg2[%c0_3, %c0_4] : memref<1x3xf32, #tpu.memory_space<vmem>>, vector<1x3xf32>
    %5 = vector.shape_cast %4 : vector<1x3xf32> to vector<1x3xf32>
    %6 = vector.broadcast %5 : vector<1x3xf32> to vector<8x3xf32>
    %c0_5 = arith.constant 0 : index
    %c0_6 = arith.constant 0 : index
    %7 = vector.load %arg4[%c0_5, %c0_6] : memref<8x3xf32, #tpu.memory_space<vmem>>, vector<8x3xf32>
    tpu.vector_store %arg4[%c0_5, %c0_6], %6 {strides = array<i32>} : memref<8x3xf32, #tpu.memory_space<vmem>>, vector<8x3xf32>,
    return
  }
  func.func @transform_0(%arg0: i32) -> (i32, i32) {
    %c0_i32 = arith.constant 0 : i32
    %c0_i32_0 = arith.constant 0 : i32
    %c0_i32_1 = arith.constant 0 : i32
    return %c0_i32, %c0_i32_0 : i32, i32
  }
  func.func @transform_1(%arg0: i32) -> (i32, i32) {
    %c0_i32 = arith.constant 0 : i32
    %c0_i32_0 = arith.constant 0 : i32
    %c0_i32_1 = arith.constant 0 : i32
    return %c0_i32, %c0_i32_0 : i32, i32
  }
  func.func @transform_2(%arg0: i32) -> (i32, i32) {
    %c0_i32 = arith.constant 0 : i32
    %c0_i32_0 = arith.constant 0 : i32
    return %arg0, %c0_i32 : i32, i32
  }
  func.func @transform_3(%arg0: i32) -> (i32, i32) {
    %c0_i32 = arith.constant 0 : i32
    %c0_i32_0 = arith.constant 0 : i32
    return %arg0, %c0_i32 : i32, i32
  }
}

</mosaic_0001>

<bundles_post_ra>
// kernel: tpu_custom_call.1
= control target key start
LH: loop header
LB: loop body
LE: loop exit
PB: predicated region body
PF: predicated region fallthrough
CT: control target
= control target key end

     0   :  { %9 = vsyncpa [#allocation3], 0  ;;  %s194_s0 = inlined_call_operand.hbm [shape: f32[1,7], index: 0, kind: input, shape index: {}]   ;;  %s195_s1 = inlined_call_operand.hbm [shape: f32[1,3], index: 1, kind: input, shape index: {}]   ;;  %s196_s2 = inlined_call_operand.hbm [shape: f32[8,7], index: 2, kind: output, shape index: {0}]   ;;  %s197_s3 = inlined_call_operand.vmem [shape: f32[8,3], index: 3, kind: output, shape index: {1}]  }
   0x1   :  { %10 = vsyncpa [#allocation6], 0 }
   0x2   :  { %11 = vsyncpa [#allocation4], 0  ;;  %s17_s14 = sshll.u32 %s194_s0, 4  ;;  %s159_s15 = smov [#allocation2]   ;;  %s18_s14 = int_to_ptr.hbm [resolvable:$true] %s17_s14 }
   0x3   :  { %s19_s16 = sshll.u32 %s159_s15, 4  ;;  %s28_s19 = sshll.u32 %s195_s1, 4  ;;  %s20_s16 = int_to_ptr.vmem [resolvable:$true] %s19_s16  ;;  %s29_s19 = int_to_ptr.hbm [resolvable:$true] %s28_s19 }
   0x4   :  { %22 = dma.hbm_to_vmem [thread:$0]  %s18_s14, 16, %s20_s16, [#allocation3]  }
   0x5   :  { %s160_s20 = smov [#allocation5]  }
   0x6   :  { %s30_s21 = sshll.u32 %s160_s20, 4  ;;  %s31_s21 = int_to_ptr.vmem [resolvable:$true] %s30_s21 }
   0x7   :  { %33 = dma.hbm_to_vmem [thread:$0]  %s29_s19, 16, %s31_s21, [#allocation6]  }
   0x8   :  { %153 = dma.done.wait [#allocation3], 16  }
   0x9   :  { %154 = vsyncadd [#allocation3], 4294967280 }
   0xa   :  { %155 = dma.done.wait [#allocation6], 16  }
   0xb   :  { %156 = vsyncadd [#allocation6], 4294967280  ;;  %s161_s22 = smov [#allocation7]   ;;  %s61_s25 = sshll.u32 %s196_s2, 4  ;;  %vm46_vm0 = vcmask 56320   ;;  %vm52_vm1 = vcmask 23552   ;;  %s62_s25 = int_to_ptr.hbm [resolvable:$true] %s61_s25 }
   0xc   :  { %s59_s0 = sshll.u32 %s161_s22, 4  ;;  %v79_v0 = vld [vmem:[#allocation2] ss:$0 sm:$0xff]  ;;  %v80_v1 = vld [vmem:[#allocation5] ss:$0 sm:$0xff]  ;;  %s60_s0 = int_to_ptr.vmem [resolvable:$true] %s59_s0 }
   0xd   :  { %47 = vst.msk [vmem:[#allocation7] sm:$0xff] %vm46_vm0, %v79_v0 }
   0xe   :  { %53 = vst.msk [vmem:[%s197_s3] sm:$0xff] %vm52_vm1, %v80_v1  ;;  %64 = dma.vmem_to_hbm [thread:$0]  %s60_s0, 128, %s62_s25, [#allocation4]  }
   0xf   :  { %157 = dma.done.wait [#allocation4], 128  }
  0x10   :  { %158 = vsyncadd [#allocation4], 4294967168 }
  0x11   :  { %73 = vsyncpa [#allocation3], 1 }
  0x12   :  { %74 = vsyncpa [#allocation6], 1 }
  0x13   :  { %75 = vsyncpa [#allocation4], 1 }

</bundles_post_ra>
